<compile_context>
chip_gen: v6e
topology: v6e:2x2x1
jax: 0.10.0
libtpu: 0.0.40
codegen_flags: <defaults>
</compile_context>

<pallas_src>
import jax
import jax.numpy as jnp
from jax import lax
from jax.experimental import pallas as pl
from jax.experimental.pallas import tpu as pltpu

LANE = 128


def _word_attention_kernel(
    x_ref, row_ref, col_ref, en_ref,    # inputs
    out_ref,                            # output (resident accumulator along the E axis)
    m_scr, l_scr):                      # SMEM scratch: online-softmax running max / sum
    e_idx = pl.program_id(1)
    n_pad = x_ref.shape[0]
    e_tile = col_ref.shape[0]

    # ---- per-D-tile init (first edge tile): online-softmax state ----
    @pl.when(e_idx == 0)
    def _init():
        m_scr[0, 0] = jnp.float32(-1e30)
        l_scr[0, 0] = jnp.float32(0.0)

    row = row_ref[...]                  # (1, E_tile) int32, lane-dense
    col = col_ref[...]                  # (E_tile, 1) int32
    energy = en_ref[...]                # (E_tile, 1) f32 (padded edges = -1e30)

    # One-hot incidence tiles, iota + compare fused per tile.  Padded edges carry the
    # out-of-range index n_pad -> all-zero one-hot rows / columns.
    oh_col = (lax.broadcasted_iota(jnp.int32, (e_tile, n_pad), 1)
              == col).astype(jnp.float32)                                 # (E_tile, N_pad)
    oh_rowT = (lax.broadcasted_iota(jnp.int32, (n_pad, e_tile), 0)
               == row).astype(jnp.float32)                                # (N_pad, E_tile)

    # Gather x[col] for this (E_tile, D_tile) block.
    gathered = jnp.dot(oh_col, x_ref[...],
                       preferred_element_type=jnp.float32)                # (E_tile, D_tile)

    # Online (flash-style) softmax over all edges.
    m_prev = m_scr[0, 0]
    m_new = jnp.maximum(m_prev, jnp.max(energy))
    alpha = jnp.exp(m_prev - m_new)
    p = jnp.exp(energy - m_new)         # (E_tile, 1); padded edges underflow to exactly 0
    l_scr[0, 0] = alpha * l_scr[0, 0] + jnp.sum(p)
    m_scr[0, 0] = m_new

    # Scatter-add the (unnormalized) messages onto rows: canonical (N,K)@(K,D) matmul,
    # no dim-0 contraction / transpose.
    scat = jnp.dot(oh_rowT, gathered * p,
                   preferred_element_type=jnp.float32)                    # (N_pad, D_tile)

    first = e_idx == 0
    rescale = m_new > m_prev

    @pl.when(first)
    def _():                            # first tile: direct store (skip zeros init / stale FMA)
        out_ref[...] = scat

    @pl.when(jnp.logical_and(jnp.logical_not(first), rescale))
    def _():                            # running max moved: rescale the resident accumulator
        out_ref[...] = alpha * out_ref[...] + scat

    @pl.when(jnp.logical_and(jnp.logical_not(first), jnp.logical_not(rescale)))
    def _():                            # running max unchanged (alpha == 1): plain accumulate
        out_ref[...] = out_ref[...] + scat

    # ---- finalize: divide by the softmax denominator ----
    @pl.when(e_idx == pl.num_programs(1) - 1)
    def _fin():
        out_ref[...] = out_ref[...] * (1.0 / l_scr[0, 0])


def word_attention(x, edge_index, edge_weight, weight, bias, *, e_tile=512, d_tile=None):
    """x: (N, D) f32, edge_index: (2, E) int, edge_weight: (E,) f32.
    weight: (1, D), bias: (1,)  (nn.Linear(hidden_dim, 1) parameters).
    d_tile: set to 128 on v7x to split the D axis across the two TensorCores."""
    N, D = x.shape
    E = edge_index.shape[1]
    f32 = jnp.float32

    if E == 0:
        # Reference: softmax over an empty edge set contributes nothing; output is zeros.
        return jnp.zeros_like(x)

    # Per-edge energies (O(N*D + E) scalar-chain work) computed in XLA; kernel stays pure
    # gather / online-softmax / scatter (perf review item #1).
    scores = jax.nn.sigmoid(x.astype(f32) @ weight.reshape(-1).astype(f32)
                            + bias.astype(f32)[0])                         # (N,)
    row_idx = edge_index[0].astype(jnp.int32)
    col_idx = edge_index[1].astype(jnp.int32)
    energy = scores[row_idx] * scores[col_idx] * edge_weight.astype(f32)   # (E,)

    # Lane-dense tile sizes.
    e_tile = max(LANE, (int(e_tile) // LANE) * LANE)     # multiple of 128 (lane-dense row block)
    d_pad = pl.cdiv(D, LANE) * LANE                      # no "+1 scores lane" anymore
    n_pad = pl.cdiv(N, LANE) * LANE
    e_pad = pl.cdiv(E, e_tile) * e_tile
    if d_tile is None:
        d_tile = d_pad
    else:
        d_tile = max(LANE, (int(d_tile) // LANE) * LANE)
        if d_pad % d_tile != 0:
            d_tile = d_pad
    n_d_tiles = d_pad // d_tile
    n_e_tiles = e_pad // e_tile

    # Padded operands: padded edges use out-of-range node index n_pad (all-zero one-hots) and
    # energy = -1e30 (softmax weight underflows to exactly 0).
    x_p = jnp.zeros((n_pad, d_pad), f32).at[:N, :D].set(x.astype(f32))
    row_p = jnp.full((1, e_pad), n_pad, jnp.int32).at[0, :E].set(row_idx)
    col_p = jnp.full((e_pad, 1), n_pad, jnp.int32).at[:E, 0].set(col_idx)
    en_p = jnp.full((e_pad, 1), -1e30, f32).at[:E, 0].set(energy)

    # Generation-aware VMEM budget: resident x / out (double-buffered), edge blocks, and the
    # per-step iota / one-hot / intermediate temporaries.  Cap at 56 MiB (v7x has 64 MiB/TC).
    resident = n_pad * d_tile * 4
    edge_blocks = 3 * e_tile * 4
    temporaries = (4 * e_tile * n_pad + 2 * e_tile * d_tile + n_pad * d_tile) * 4
    est = 4 * resident + 2 * edge_blocks + temporaries
    vmem_limit = int(min(56 * 2 ** 20, max(32 * 2 ** 20, 2 * est)))

    flops = 2 * (2 * e_pad * n_pad * d_pad)              # gather + scatter matmuls (all D tiles)
    cost = pl.CostEstimate(
        flops=flops,
        transcendentals=2 * e_pad * n_d_tiles,
        bytes_accessed=(x_p.size + row_p.size + col_p.size + en_p.size + n_pad * d_pad) * 4)

    grid_spec = pltpu.PrefetchScalarGridSpec(
        num_scalar_prefetch=0,
        grid=(n_d_tiles, n_e_tiles),                     # (parallel D tiles, arbitrary E tiles)
        in_specs=[
            pl.BlockSpec((n_pad, d_tile), lambda d, e: (0, d)),   # x: resident along the E axis
            pl.BlockSpec((1, e_tile), lambda d, e: (0, e)),       # row (lane-dense)
            pl.BlockSpec((e_tile, 1), lambda d, e: (e, 0)),       # col
            pl.BlockSpec((e_tile, 1), lambda d, e: (e, 0)),       # energy
        ],
        out_specs=pl.BlockSpec((n_pad, d_tile), lambda d, e: (0, d)),  # resident accumulator
        scratch_shapes=[
            pltpu.SMEM((1, 1), f32),   # online-softmax running max
            pltpu.SMEM((1, 1), f32),   # online-softmax running sum
        ],
    )

    out_p = pl.pallas_call(
        _word_attention_kernel,
        out_shape=jax.ShapeDtypeStruct((n_pad, d_pad), f32),
        grid_spec=grid_spec,
        compiler_params=pltpu.CompilerParams(
            dimension_semantics=("parallel", "arbitrary"),
            vmem_limit_bytes=vmem_limit,
        ),
        cost_estimate=cost,
    )(x_p, row_p, col_p, en_p)

    return out_p[:N, :D].astype(x.dtype)


def word_attention_reference(x, edge_index, edge_weight, weight, bias):
    row, col = edge_index[0], edge_index[1]
    scores = jax.nn.sigmoid(x @ weight.reshape(-1, 1) + bias).squeeze(-1)   # (N,)
    energy = scores[row] * scores[col] * edge_weight                        # (E,)
    aw = jax.nn.softmax(energy, axis=0)
    msgs = x[col] * aw[:, None]                                             # (E, D)
    return jnp.zeros_like(x).at[row].add(msgs)


def _run_case(key, N, D, E, **kw):
    k_x, k_w, k_b, k_ei, k_ew = jax.random.split(key, 5)
    x = jax.random.normal(k_x, (N, D), dtype=jnp.float32)
    weight = jax.random.normal(k_w, (1, D), dtype=jnp.float32) * 0.1   # Linear(D, 1).weight
    bias = jax.random.normal(k_b, (1,), dtype=jnp.float32) * 0.1       # Linear(D, 1).bias
    edge_index = jax.random.randint(k_ei, (2, E), 0, N, dtype=jnp.int32)
    edge_weight = jax.random.uniform(k_ew, (E,), dtype=jnp.float32)

    out = jax.block_until_ready(word_attention(x, edge_index, edge_weight, weight, bias, **kw))
    ref = word_attention_reference(x, edge_index, edge_weight, weight, bias)
    assert out.shape == (N, D) and out.dtype == jnp.float32
    assert jnp.allclose(out, ref, atol=1e-5, rtol=1e-5), "mismatch vs reference"


if __name__ == "__main__":
    key = jax.random.PRNGKey(0)
    k1, k2 = jax.random.split(key)

    # Case 1: multi-edge-tile grid (3 E tiles incl. padding) -> exercises the online softmax,
    # gated rescale, plain-accumulate, and padded-edge paths.
    _run_case(k1, N=16, D=32, E=300, e_tile=128)

    # Case 2: multi-D-tile grid (2 "parallel" D tiles x 2 E tiles) -> exercises the v7x
    # megacore split with per-D-tile softmax recomputation.
    _run_case(k2, N=24, D=160, E=200, e_tile=128, d_tile=128)

    print("KERNEL_OK")
</pallas_src>

<mosaic_0001>
module attributes {stable_mosaic.version = 11 : i64} {
  func.func @_word_attention_kernel(%arg0: i32, %arg1: i32, %arg2: memref<128x128xf32, #tpu.memory_space<vmem>>, %arg3: memref<1x128xi32, #tpu.memory_space<vmem>>, %arg4: memref<128x1xi32, #tpu.memory_space<vmem>>, %arg5: memref<128x1xf32, #tpu.memory_space<vmem>>, %arg6: memref<128x128xf32, #tpu.memory_space<vmem>>, %arg7: memref<1x1xf32, #tpu.memory_space<smem>>, %arg8: memref<1x1xf32, #tpu.memory_space<smem>>) attributes {dimension_semantics = [#tpu.dimension_semantics<parallel>, #tpu.dimension_semantics<arbitrary>], iteration_bounds = array<i64: 1, 3>, scalar_prefetch = 0 : i64, scratch_operands = 2 : i64, tpu.core_type = #tpu.core_type<tc>, window_params = [{transform_indices = @transform_0, window_bounds = array<i64: 128, 128>}, {transform_indices = @transform_1, window_bounds = array<i64: 1, 128>}, {transform_indices = @transform_2, window_bounds = array<i64: 128, 1>}, {transform_indices = @transform_3, window_bounds = array<i64: 128, 1>}, {transform_indices = @transform_4, window_bounds = array<i64: 128, 128>}]} {
    %c0_i32 = arith.constant 0 : i32
    %0 = arith.cmpi eq, %arg1, %c0_i32 : i32
    %1 = arith.extui %0 : i1 to i32
    %c0_i32_0 = arith.constant 0 : i32
    %2 = arith.cmpi ne, %1, %c0_i32_0 : i32
    scf.if %2 {
      %cst_26 = arith.constant -1.000000e+30 : f32
      %c0_27 = arith.constant 0 : index
      %c0_28 = arith.constant 0 : index
      %57 = memref.load %arg7[%c0_27, %c0_28] : memref<1x1xf32, #tpu.memory_space<smem>>
      memref.store %cst_26, %arg7[%c0_27, %c0_28] : memref<1x1xf32, #tpu.memory_space<smem>>
      %cst_29 = arith.constant 0.000000e+00 : f32
      %c0_30 = arith.constant 0 : index
      %c0_31 = arith.constant 0 : index
      %58 = memref.load %arg8[%c0_30, %c0_31] : memref<1x1xf32, #tpu.memory_space<smem>>
      memref.store %cst_29, %arg8[%c0_30, %c0_31] : memref<1x1xf32, #tpu.memory_space<smem>>
    } else {
    }
    %c0 = arith.constant 0 : index
    %c0_1 = arith.constant 0 : index
    %3 = vector.load %arg3[%c0, %c0_1] : memref<1x128xi32, #tpu.memory_space<vmem>>, vector<1x128xi32>
    %c0_2 = arith.constant 0 : index
    %c0_3 = arith.constant 0 : index
    %4 = vector.load %arg4[%c0_2, %c0_3] : memref<128x1xi32, #tpu.memory_space<vmem>>, vector<128x1xi32>
    %c0_4 = arith.constant 0 : index
    %c0_5 = arith.constant 0 : index
    %5 = vector.load %arg5[%c0_4, %c0_5] : memref<128x1xf32, #tpu.memory_space<vmem>>, vector<128x1xf32>
    %6 = tpu.iota {dimensions = array<i32: 1>} : vector<128x128xi32>
    %7 = vector.broadcast %4 : vector<128x1xi32> to vector<128x128xi32>
    %8 = arith.cmpi eq, %6, %7 : vector<128x128xi32>
    %9 = arith.extui %8 : vector<128x128xi1> to vector<128x128xi32>
    %10 = arith.sitofp %9 : vector<128x128xi32> to vector<128x128xf32>
    %11 = tpu.iota {dimensions = array<i32: 0>} : vector<128x128xi32>
    %12 = vector.broadcast %3 : vector<1x128xi32> to vector<128x128xi32>
    %13 = arith.cmpi eq, %11, %12 : vector<128x128xi32>
    %14 = arith.extui %13 : vector<128x128xi1> to vector<128x128xi32>
    %15 = arith.sitofp %14 : vector<128x128xi32> to vector<128x128xf32>
    %c0_6 = arith.constant 0 : index
    %c0_7 = arith.constant 0 : index
    %16 = vector.load %arg2[%c0_6, %c0_7] : memref<128x128xf32, #tpu.memory_space<vmem>>, vector<128x128xf32>
    %cst = arith.constant dense<0.000000e+00> : vector<128x128xf32>
    %17 = tpu.matmul %10, %16, %cst {dimension_numbers = #tpu.dot_dimension_numbers<[1], [0], [0], [1], [0, 0, 1, 1], [], []>} : vector<128x128xf32>, vector<128x128xf32>, vector<128x128xf32> -> vector<128x128xf32>
    %c0_8 = arith.constant 0 : index
    %c0_9 = arith.constant 0 : index
    %18 = memref.load %arg7[%c0_8, %c0_9] : memref<1x1xf32, #tpu.memory_space<smem>>
    %19 = vector.shape_cast %5 : vector<128x1xf32> to vector<1x128x1xf32>
    %cst_10 = arith.constant dense<0xFF800000> : vector<1xf32>
    %20 = vector.multi_reduction <maximumf>, %19, %cst_10 [1, 2] : vector<1x128x1xf32> to vector<1xf32>
    %21 = vector.shape_cast %20 : vector<1xf32> to vector<1x1x1xf32>
    %22 = vector.extract %21[0, 0, 0] : f32 from vector<1x1x1xf32>
    %23 = arith.maximumf %18, %22 : f32
    %24 = arith.subf %18, %23 : f32
    %25 = math.exp %24 : f32
    %26 = vector.broadcast %23 : f32 to vector<128x1xf32>
    %27 = arith.subf %5, %26 : vector<128x1xf32>
    %28 = math.exp %27 : vector<128x1xf32>
    %c0_11 = arith.constant 0 : index
    %c0_12 = arith.constant 0 : index
    %29 = memref.load %arg8[%c0_11, %c0_12] : memref<1x1xf32, #tpu.memory_space<smem>>
    %30 = arith.mulf %25, %29 : f32
    %31 = vector.shape_cast %28 : vector<128x1xf32> to vector<1x128x1xf32>
    %cst_13 = arith.constant dense<0.000000e+00> : vector<1xf32>
    %32 = vector.multi_reduction <add>, %31, %cst_13 [1, 2] : vector<1x128x1xf32> to vector<1xf32>
    %33 = vector.shape_cast %32 : vector<1xf32> to vector<1x1x1xf32>
    %34 = vector.extract %33[0, 0, 0] : f32 from vector<1x1x1xf32>
    %35 = arith.addf %30, %34 : f32
    %c0_14 = arith.constant 0 : index
    %c0_15 = arith.constant 0 : index
    %36 = memref.load %arg8[%c0_14, %c0_15] : memref<1x1xf32, #tpu.memory_space<smem>>
    memref.store %35, %arg8[%c0_14, %c0_15] : memref<1x1xf32, #tpu.memory_space<smem>>
    %c0_16 = arith.constant 0 : index
    %c0_17 = arith.constant 0 : index
    %37 = memref.load %arg7[%c0_16, %c0_17] : memref<1x1xf32, #tpu.memory_space<smem>>
    memref.store %23, %arg7[%c0_16, %c0_17] : memref<1x1xf32, #tpu.memory_space<smem>>
    %38 = vector.broadcast %28 : vector<128x1xf32> to vector<128x128xf32>
    %39 = arith.mulf %17, %38 : vector<128x128xf32>
    %cst_18 = arith.constant dense<0.000000e+00> : vector<128x128xf32>
    %40 = tpu.matmul %15, %39, %cst_18 {dimension_numbers = #tpu.dot_dimension_numbers<[1], [0], [0], [1], [0, 0, 1, 1], [], []>} : vector<128x128xf32>, vector<128x128xf32>, vector<128x128xf32> -> vector<128x128xf32>
    %c0_i32_19 = arith.constant 0 : i32
    %41 = arith.cmpi eq, %arg1, %c0_i32_19 : i32
    %42 = arith.cmpf ogt, %23, %18 : f32
    %43 = arith.extui %41 : i1 to i32
    %c0_i32_20 = arith.constant 0 : i32
    %44 = arith.cmpi ne, %43, %c0_i32_20 : i32
    scf.if %44 {
      %c0_26 = arith.constant 0 : index
      %c0_27 = arith.constant 0 : index
      %57 = vector.load %arg6[%c0_26, %c0_27] : memref<128x128xf32, #tpu.memory_space<vmem>>, vector<128x128xf32>
      tpu.vector_store %arg6[%c0_26, %c0_27], %40 {strides = array<i32>} : memref<128x128xf32, #tpu.memory_space<vmem>>, vector<128x128xf32>,
    } else {
    }
    %true = arith.constant true
    %45 = arith.xori %41, %true : i1
    %46 = arith.andi %45, %42 : i1
    %47 = arith.extui %46 : i1 to i32
    %c0_i32_21 = arith.constant 0 : i32
    %48 = arith.cmpi ne, %47, %c0_i32_21 : i32
    scf.if %48 {
      %c0_26 = arith.constant 0 : index
      %c0_27 = arith.constant 0 : index
      %57 = vector.load %arg6[%c0_26, %c0_27] : memref<128x128xf32, #tpu.memory_space<vmem>>, vector<128x128xf32>
      %58 = vector.broadcast %25 : f32 to vector<128x128xf32>
      %59 = arith.mulf %58, %57 : vector<128x128xf32>
      %60 = arith.addf %59, %40 : vector<128x128xf32>
      %c0_28 = arith.constant 0 : index
      %c0_29 = arith.constant 0 : index
      %61 = vector.load %arg6[%c0_28, %c0_29] : memref<128x128xf32, #tpu.memory_space<vmem>>, vector<128x128xf32>
      tpu.vector_store %arg6[%c0_28, %c0_29], %60 {strides = array<i32>} : memref<128x128xf32, #tpu.memory_space<vmem>>, vector<128x128xf32>,
    } else {
    }
    %true_22 = arith.constant true
    %49 = arith.xori %41, %true_22 : i1
    %true_23 = arith.constant true
    %50 = arith.xori %42, %true_23 : i1
    %51 = arith.andi %49, %50 : i1
    %52 = arith.extui %51 : i1 to i32
    %c0_i32_24 = arith.constant 0 : i32
    %53 = arith.cmpi ne, %52, %c0_i32_24 : i32
    scf.if %53 {
      %c0_26 = arith.constant 0 : index
      %c0_27 = arith.constant 0 : index
      %57 = vector.load %arg6[%c0_26, %c0_27] : memref<128x128xf32, #tpu.memory_space<vmem>>, vector<128x128xf32>
      %58 = arith.addf %57, %40 : vector<128x128xf32>
      %c0_28 = arith.constant 0 : index
      %c0_29 = arith.constant 0 : index
      %59 = vector.load %arg6[%c0_28, %c0_29] : memref<128x128xf32, #tpu.memory_space<vmem>>, vector<128x128xf32>
      tpu.vector_store %arg6[%c0_28, %c0_29], %58 {strides = array<i32>} : memref<128x128xf32, #tpu.memory_space<vmem>>, vector<128x128xf32>,
    } else {
    }
    %c2_i32 = arith.constant 2 : i32
    %54 = arith.cmpi eq, %arg1, %c2_i32 : i32
    %55 = arith.extui %54 : i1 to i32
    %c0_i32_25 = arith.constant 0 : i32
    %56 = arith.cmpi ne, %55, %c0_i32_25 : i32
    scf.if %56 {
      %c0_26 = arith.constant 0 : index
      %c0_27 = arith.constant 0 : index
      %57 = vector.load %arg6[%c0_26, %c0_27] : memref<128x128xf32, #tpu.memory_space<vmem>>, vector<128x128xf32>
      %c0_28 = arith.constant 0 : index
      %c0_29 = arith.constant 0 : index
      %58 = memref.load %arg8[%c0_28, %c0_29] : memref<1x1xf32, #tpu.memory_space<smem>>
      %cst_30 = arith.constant 1.000000e+00 : f32
      %59 = arith.divf %cst_30, %58 : f32
      %60 = vector.broadcast %59 : f32 to vector<128x128xf32>
      %61 = arith.mulf %57, %60 : vector<128x128xf32>
      %c0_31 = arith.constant 0 : index
      %c0_32 = arith.constant 0 : index
      %62 = vector.load %arg6[%c0_31, %c0_32] : memref<128x128xf32, #tpu.memory_space<vmem>>, vector<128x128xf32>
      tpu.vector_store %arg6[%c0_31, %c0_32], %61 {strides = array<i32>} : memref<128x128xf32, #tpu.memory_space<vmem>>, vector<128x128xf32>,
    } else {
    }
    return
  }
  func.func @transform_0(%arg0: i32, %arg1: i32) -> (i32, i32) {
    %c0_i32 = arith.constant 0 : i32
    %c0_i32_0 = arith.constant 0 : i32
    return %c0_i32, %arg0 : i32, i32
  }
  func.func @transform_1(%arg0: i32, %arg1: i32) -> (i32, i32) {
    %c0_i32 = arith.constant 0 : i32
    %c0_i32_0 = arith.constant 0 : i32
    return %c0_i32, %arg1 : i32, i32
  }
  func.func @transform_2(%arg0: i32, %arg1: i32) -> (i32, i32) {
    %c0_i32 = arith.constant 0 : i32
    %c0_i32_0 = arith.constant 0 : i32
    return %arg1, %c0_i32 : i32, i32
  }
  func.func @transform_3(%arg0: i32, %arg1: i32) -> (i32, i32) {
    %c0_i32 = arith.constant 0 : i32
    %c0_i32_0 = arith.constant 0 : i32
    return %arg1, %c0_i32 : i32, i32
  }
  func.func @transform_4(%arg0: i32, %arg1: i32) -> (i32, i32) {
    %c0_i32 = arith.constant 0 : i32
    %c0_i32_0 = arith.constant 0 : i32
    return %c0_i32, %arg0 : i32, i32
  }
}

</mosaic_0001>

<bundles_post_ra>
// kernel: tpu_custom_call.1
= control target key start
LH: loop header
LB: loop body
LE: loop exit
PB: predicated region body
PF: predicated region fallthrough
CT: control target
= control target key end

     0   :  { %9 = vsyncpa [#allocation5], 0  ;;  %s1735_s15 = smov 0   ;;  %s1737_s16 = smov 0   ;;  %s2257_s0 = inlined_call_operand.vmem [shape: f32[128,128], index: 0, kind: input, shape index: {}]   ;;  %s2258_s1 = inlined_call_operand.vmem [shape: s32[1,384], index: 1, kind: input, shape index: {}]   ;;  %s2259_s2 = inlined_call_operand.vmem [shape: s32[384,1], index: 2, kind: input, shape index: {}]   ;;  %s2260_s3 = inlined_call_operand.vmem [shape: f32[384,1], index: 3, kind: input, shape index: {}]   ;;  %s2261_s4 = inlined_call_operand.hbm [shape: f32[128,128], index: 4, kind: output, shape index: {}]  }
   0x1   :  { %s1739_s17 = smov 0  }
   0x2 LB: > { %s1307_s18 = sadd.s32 4294967295, %s1701_s17   ;;  %s24_s19 = sadd.s32 1, %s1697_s16  ;;  %s1701_s17 = sphi %s1739_s17, %s15_s17   ;;  %s1697_s16 = sphi %s1737_s16, %s2264_s16   ;;  %s1693_s15 = sphi %s1735_s15, %s2263_s15  }
   0x3   : > { %p25_p0 = scmp.ge.s32.totalorder %s24_s19, 3  ;;  %p1311_p1 = scmp.ge.s32.totalorder %s1701_s17, 1 }
   0x4   : > { %p204_p2 = scmp.lt.s32.totalorder %s1701_s17, 4 }
   0x5   : > { %s2266_s19 = smov (%p25_p0, %s24_s19), 0 }
   0x6   : > { %p205_p3 = pnand %p1311_p1, %p204_p2 }
   0x7   : > { %s1312_s20 = sshll.u32 (!%p205_p3), %s1693_s15, 4  ;;  %p1316_p4 = scmp.ne.s32.totalorder (!%p205_p3), %s1693_s15, 0 }
   0x8   : > { %208 = sbr.rel (%p205_p3) target bundleno = 851 (0x353), region = 36  ;;  %p245_p5 = scmp.lt.s32.totalorder (!%p205_p3), %s1312_s20, 47 }
   0x9   : > { %p1579_p6 = scmp.eq.s32.totalorder (!%p205_p3), %s1693_s15, 0  ;;  %p241_p8 = scmp.lt.s32.totalorder (!%p205_p3), %s1693_s15, 2 }
   0xd   : > { %v479_v0 = vld [vmem:[%s2257_s0 + $0x78] sm:$0xff]  ;;  %v1703_v1 = vmov 0   ;;  %v478_v2 = vld [vmem:[%s2257_s0 + $0x70] sm:$0xff]  ;;  %s2268_s20 = smov (!%p245_p5, %s1312_s20), 47  ;;  %v477_v3 = vld [vmem:[%s2257_s0 + $0x68] sm:$0xff]  ;;  %vm626_vm0 = vcmask 7168  }
   0xe   : > { %1613 = vset.pattern.permute.xlu0 %v1703_v1  ;;  %1614 = vset.pattern.permute.xlu1 %v1703_v1  ;;  %s1313_s27 = sshll.u32 %s2268_s20, 3  ;;  %v476_v4 = vld [vmem:[%s2257_s0 + $0x60] sm:$0xff]  ;;  %v475_v7 = vld [vmem:[%s2257_s0 + $0x58] sm:$0xff]  ;;  %v474_v10 = vld [vmem:[%s2257_s0 + $0x50] sm:$0xff]  ;;  %s1704_s20 = smov -1e+30  }
   0xf   : > { %1452 = vmatprep.subr.mxu0 %v479_v0  ;;  %s1775_s30 = scalar_lea.vmem %s2259_s2, %s1313_s27  ;;  %v473_v13 = vld [vmem:[%s2257_s0 + $0x48] sm:$0xff]  ;;  %v472_v14 = vld [vmem:[%s2257_s0 + $0x40] sm:$0xff]  ;;  %v471_v17 = vld [vmem:[%s2257_s0 + $0x38] sm:$0xff]  ;;  %s1834_s13 = scalar_lea.vmem %s2260_s3, %s1313_s27 }
  0x10   : > { %1453 = vmatpush3.msra.mxu0 %v479_v0  ;;  %v265_v5 = vld [vmem:[%s1775_s30] sm:$0xff]  ;;  %v267_v6 = vld [vmem:[%s1775_s30 + $0x10] sm:$0xff]  ;;  %v266_v8 = vld [vmem:[%s1775_s30 + $0x8] sm:$0xff]  ;;  %1573 = sst [smem:[#allocation2]] (%p1579_p6), %s1704_s20  ;;  %s1706_s27 = smov 0.0  }
  0x11   : > { %1454 = vmatprep.subr.mxu0 %v478_v2  ;;  %300 = vperm.xlu0 %1613, %v265_v5   ;;  %v268_v9 = vld [vmem:[%s1775_s30 + $0x18] sm:$0xff]  ;;  %v269_v11 = vld [vmem:[%s1775_s30 + $0x20] sm:$0xff]  ;;  %v270_v12 = vld [vmem:[%s1775_s30 + $0x28] sm:$0xff]  ;;  %1574 = sst [smem:[#allocation3]] (%p1579_p6), %s1706_s27 }
  0x12   : > { %1455 = vmatpush3.msra.mxu0 %v478_v2  ;;  %306 = vperm.xlu1 %1614, %v267_v6   ;;  %v271_v15 = vld [vmem:[%s1775_s30 + $0x30] sm:$0xff]  ;;  %v272_v16 = vld [vmem:[%s1775_s30 + $0x38] sm:$0xff]  ;;  %v273_v18 = vld [vmem:[%s1775_s30 + $0x40] sm:$0xff]  ;;  %s1941_s21 = sld [smem:[#allocation2]] }
  0x13   : > { %1456 = vmatprep.subr.mxu0 %v477_v3  ;;  %v274_v19 = vld [vmem:[%s1775_s30 + $0x48] sm:$0xff]  ;;  %v470_v20 = vld [vmem:[%s2257_s0 + $0x30] sm:$0xff]  ;;  %v276_v23 = vld [vmem:[%s1775_s30 + $0x58] sm:$0xff]  ;;  %s242_s25 = scalar_select %p241_p8, %s1693_s15, 2 }
  0x14   : > { %1457 = vmatpush3.msra.mxu0 %v477_v3  ;;  %v469_v21 = vld [vmem:[%s2257_s0 + $0x28] sm:$0xff]  ;;  %v275_v22 = vld [vmem:[%s1775_s30 + $0x50] sm:$0xff]  ;;  %v468_v24 = vld [vmem:[%s2257_s0 + $0x20] sm:$0xff]  ;;  %s722_s5 = sld [smem:[#allocation3]] }
  0x15   : > { %1458 = vmatprep.subr.mxu0 %v476_v4  ;;  %303 = vperm.xlu0 %1613, %v266_v8   ;;  %v277_v25 = vld [vmem:[%s1775_s30 + $0x60] sm:$0xff]  ;;  %v278_v26 = vld [vmem:[%s1775_s30 + $0x68] sm:$0xff]  ;;  %v467_v27 = vld [vmem:[%s2257_s0 + $0x18] sm:$0xff]  ;;  %s243_s29 = scalar_lea.vmem %s2258_s1, %s242_s25 }
  0x16   : > { %1459 = vmatpush3.msra.mxu0 %v476_v4  ;;  %309 = vperm.xlu1 %1614, %v268_v9   ;;  %v466_v28 = vld [vmem:[%s2257_s0 + $0x10] sm:$0xff]  ;;  %v280_v30 = vld [vmem:[%s1775_s30 + $0x78] sm:$0xff]  ;;  %v465_v31 = vld [vmem:[%s2257_s0 + $0x8] sm:$0xff] }
  0x17   : > { %1460 = vmatprep.subr.mxu0 %v475_v7  ;;  %v279_v29 = vld [vmem:[%s1775_s30 + $0x70] sm:$0xff]  ;;  %v464_v32 = vld [vmem:[%s2257_s0] sm:$0xff]  ;;  %v1843_v34 = vld [vmem:[%s1834_s13 + $0x8] sm:$0xff] }
  0x18   : > { %1461 = vmatpush3.msra.mxu0 %v475_v7  ;;  %v1840_v33 = vld [vmem:[%s1834_s13] sm:$0xff]  ;;  %v1846_v35 = vld [vmem:[%s1834_s13 + $0x10] sm:$0xff]  ;;  %v1849_v36 = vld [vmem:[%s1834_s13 + $0x18] sm:$0xff]  ;;  %v628_v42 = vsel %vm626_vm0, %v1843_v34, -inf }
  0x19   : > { %1462 = vmatprep.subr.mxu0 %v474_v10  ;;  %312 = vperm.xlu0 %1613, %v269_v11   ;;  %v1852_v37 = vld [vmem:[%s1834_s13 + $0x20] sm:$0xff]  ;;  %v1855_v38 = vld [vmem:[%s1834_s13 + $0x28] sm:$0xff]  ;;  %v1858_v39 = vld [vmem:[%s1834_s13 + $0x30] sm:$0xff]  ;;  %v627_v41 = vsel %vm626_vm0, %v1840_v33, -inf  ;;  %v629_v43 = vsel %vm626_vm0, %v1846_v35, -inf  ;;  %v630_v44 = vsel %vm626_vm0, %v1849_v36, -inf }
  0x1a   : > { %1463 = vmatpush3.msra.mxu0 %v474_v10  ;;  %315 = vperm.xlu1 %1614, %v270_v12   ;;  %v1861_v40 = vld [vmem:[%s1834_s13 + $0x38] sm:$0xff]  ;;  %v1872_v45 = vld [vmem:[%s1834_s13 + $0x40] sm:$0xff]  ;;  %v631_v46 = vsel %vm626_vm0, %v1852_v37, -inf  ;;  %v633_v47 = vsel %vm626_vm0, %v1855_v38, -inf  ;;  %v635_v48 = vsel %vm626_vm0, %v1858_v39, -inf  ;;  %v1883_v50 = vld [vmem:[%s1834_s13 + $0x48] sm:$0xff] }
  0x1b   : > { %1464 = vmatprep.subr.mxu0 %v473_v13  ;;  %v637_v49 = vsel %vm626_vm0, %v1861_v40, -inf  ;;  %v1886_v51 = vld [vmem:[%s1834_s13 + $0x50] sm:$0xff]  ;;  %v1889_v52 = vld [vmem:[%s1834_s13 + $0x58] sm:$0xff]  ;;  %v632_v53 = vmax.f32 %v627_v41, %v631_v46  ;;  %v634_v54 = vmax.f32 %v628_v42, %v633_v47  ;;  %v636_v55 = vmax.f32 %v629_v43, %v635_v48  ;;  %v1892_v57 = vld [vmem:[%s1834_s13 + $0x60] sm:$0xff] }
  0x1c   : > { %1465 = vmatpush3.msra.mxu0 %v473_v13  ;;  %v638_v56 = vmax.f32 %v630_v44, %v637_v49  ;;  %v639_v58 = vsel %vm626_vm0, %v1872_v45, -inf  ;;  %v641_v59 = vsel %vm626_vm0, %v1883_v50, -inf  ;;  %v643_v60 = vsel %vm626_vm0, %v1886_v51, -inf  ;;  %v1903_v62 = vld [vmem:[%s1834_s13 + $0x68] sm:$0xff]  ;;  %v1906_v63 = vld [vmem:[%s1834_s13 + $0x70] sm:$0xff]  ;;  %v1909_v0 = vld [vmem:[%s1834_s13 + $0x78] sm:$0xff] }
  0x1d   : > { %1466 = vmatprep.subr.mxu0 %v472_v14  ;;  %318 = vperm.xlu0 %1613, %v271_v15   ;;  %v645_v61 = vsel %vm626_vm0, %v1889_v52, -inf  ;;  %v640_v1 = vmax.f32 %v632_v53, %v639_v58  ;;  %v642_v2 = vmax.f32 %v634_v54, %v641_v59  ;;  %v644_v3 = vmax.f32 %v636_v55, %v643_v60 }
  0x1e   : > { %321 = vperm.xlu1 %1614, %v272_v16   ;;  %1467 = vmatpush3.msra.mxu0 %v472_v14  ;;  %v646_v4 = vmax.f32 %v638_v56, %v645_v61  ;;  %v647_v5 = vsel %vm626_vm0, %v1892_v57, -inf  ;;  %v649_v6 = vsel %vm626_vm0, %v1903_v62, -inf  ;;  %v651_v7 = vsel %vm626_vm0, %v1906_v63, -inf }
  0x1f   : > { %1468 = vmatprep.subr.mxu0 %v471_v17  ;;  %v653_v8 = vsel %vm626_vm0, %v1909_v0, -inf  ;;  %v648_v9 = vmax.f32 %v640_v1, %v647_v5  ;;  %v650_v10 = vmax.f32 %v642_v2, %v649_v6  ;;  %v652_v11 = vmax.f32 %v644_v3, %v651_v7 }
  0x20   : > { %1469 = vmatpush3.msra.mxu0 %v471_v17  ;;  %v654_v12 = vmax.f32 %v646_v4, %v653_v8  ;;  %v297_v16 = vlaneseq }
  0x21   : > { %324 = vperm.xlu0 %1613, %v273_v18   ;;  %1470 = vmatprep.subr.mxu0 %v470_v20  ;;  %v655_v13 = vmax.f32 %v648_v9, %v650_v10 }
  0x22   : > { %327 = vperm.xlu1 %1614, %v274_v19   ;;  %1471 = vmatpush3.msra.mxu0 %v470_v20  ;;  %v656_v14 = vmax.f32 %v652_v11, %v654_v12  ;;  %v298_v17 = vand.u32 127, %v297_v16  ;;  %v1705_v20 = vmov 1.0  }
  0x23   : > { %1472 = vmatprep.subr.mxu0 %v469_v21 }
  0x24   : > { %1473 = vmatpush3.msra.mxu0 %v469_v21  ;;  %v657_v15 = vmax.f32 %v655_v13, %v656_v14 }
  0x25   : > { %330 = vperm.xlu0 %1613, %v275_v22   ;;  %1474 = vmatprep.subr.mxu0 %v468_v24 }
  0x26   : > { %333 = vperm.xlu1 %1614, %v276_v23   ;;  %1475 = vmatpush3.msra.mxu0 %v468_v24 }
  0x27   : > { %1476 = vmatprep.subr.mxu0 %v467_v27 }
  0x28   : > { %1477 = vmatpush3.msra.mxu0 %v467_v27 }
  0x29   : > { %336 = vperm.xlu0 %1613, %v277_v25   ;;  %1478 = vmatprep.subr.mxu0 %v466_v28 }
  0x2a   : > { %339 = vperm.xlu1 %1614, %v278_v26   ;;  %1479 = vmatpush3.msra.mxu0 %v466_v28 }
  0x2b   : > { %1480 = vmatprep.subr.mxu0 %v465_v31 }
  0x2c   : > { %1481 = vmatpush3.msra.mxu0 %v465_v31 }
  0x2d   : > { %342 = vperm.xlu0 %1613, %v279_v29   ;;  %1482 = vmatprep.subr.mxu0 %v464_v32 }
  0x2e   : > { %345 = vperm.xlu1 %1614, %v280_v30   ;;  %1483 = vmatpush3.msra.mxu0 %v464_v32 }
  0x4c   : > { %658 = vmax.xlane.f32.xlu0 %v657_v15 }
  0x8c   : > { %v301_v18 = vpop.permute.xlu0 %300 }
  0x8d   : > { %v307_v19 = vpop.permute.xlu1 %306  ;;  %vm347_vm1 = vcmp.eq.s32.totalorder %v298_v17, %v301_v18 }
  0x8e   : > { %1484 = vmatprep.mubr.msk.f32.mxu0 %vm347_vm1, %v1705_v20  ;;  %vm349_vm2 = vcmp.eq.s32.totalorder %v298_v17, %v307_v19 }
  0x90   : > { %v304_v21 = vpop.permute.xlu0 %303 }
  0x91   : > { %v310_v22 = vpop.permute.xlu1 %309  ;;  %vm348_vm3 = vcmp.eq.s32.totalorder %v298_v17, %v304_v21 }
  0x92   : > { %1485 = vmatmul.mubr.msk.f32.vlgmr.msra.gmra.mxu0 %vm348_vm3, %v1705_v20  ;;  %vm350_vm4 = vcmp.eq.s32.totalorder %v298_v17, %v310_v22 }
  0x93   : > { %1487 = vmatprep.mubr.msk.f32.mxu0 %vm349_vm2, %v1705_v20 }
  0x94   : > { %v313_v23 = vpop.permute.xlu0 %312 }
  0x95   : > { %v316_v24 = vpop.permute.xlu1 %315  ;;  %vm351_vm5 = vcmp.eq.s32.totalorder %v298_v17, %v313_v23 }
  0x96   : > { %1488 = vmatmul.mubr.msk.f32.gmra.mxu0 %vm350_vm4, %v1705_v20  ;;  %vm352_vm6 = vcmp.eq.s32.totalorder %v298_v17, %v316_v24 }
  0x97   : > { %1490 = vmatprep.mubr.msk.f32.mxu0 %vm351_vm5, %v1705_v20 }
  0x98   : > { %v319_v25 = vpop.permute.xlu0 %318 }
  0x99   : > { %v322_v26 = vpop.permute.xlu1 %321  ;;  %vm353_vm7 = vcmp.eq.s32.totalorder %v298_v17, %v319_v25 }
  0x9a   : > { %1491 = vmatmul.mubr.msk.f32.gmra.mxu0 %vm352_vm6, %v1705_v20  ;;  %vm354_vm8 = vcmp.eq.s32.totalorder %v298_v17, %v322_v26 }
  0x9b   : > { %1493 = vmatprep.mubr.msk.f32.mxu0 %vm353_vm7, %v1705_v20 }
  0x9c   : > { %v325_v27 = vpop.permute.xlu0 %324 }
  0x9d   : > { %v328_v28 = vpop.permute.xlu1 %327  ;;  %vm355_vm9 = vcmp.eq.s32.totalorder %v298_v17, %v325_v27 }
  0x9e   : > { %1494 = vmatmul.mubr.msk.f32.gmra.mxu0 %vm354_vm8, %v1705_v20  ;;  %vm356_vm10 = vcmp.eq.s32.totalorder %v298_v17, %v328_v28 }
  0x9f   : > { %1496 = vmatprep.mubr.msk.f32.mxu0 %vm355_vm9, %v1705_v20 }
  0xa0   : > { %v331_v29 = vpop.permute.xlu0 %330 }
  0xa1   : > { %v334_v30 = vpop.permute.xlu1 %333  ;;  %vm357_vm11 = vcmp.eq.s32.totalorder %v298_v17, %v331_v29 }
  0xa2   : > { %1497 = vmatmul.mubr.msk.f32.gmra.mxu0 %vm356_vm10, %v1705_v20  ;;  %vm358_vm12 = vcmp.eq.s32.totalorder %v298_v17, %v334_v30 }
  0xa3   : > { %1499 = vmatprep.mubr.msk.f32.mxu0 %vm357_vm11, %v1705_v20 }
  0xa4   : > { %v337_v31 = vpop.permute.xlu0 %336 }
  0xa5   : > { %v340_v32 = vpop.permute.xlu1 %339  ;;  %vm359_vm13 = vcmp.eq.s32.totalorder %v298_v17, %v337_v31 }
  0xa6   : > { %1500 = vmatmul.mubr.msk.f32.gmra.mxu0 %vm358_vm12, %v1705_v20  ;;  %vm360_vm14 = vcmp.eq.s32.totalorder %v298_v17, %v340_v32 }
  0xa7   : > { %1502 = vmatprep.mubr.msk.f32.mxu0 %vm359_vm13, %v1705_v20 }
  0xa8   : > { %v343_v41 = vpop.permute.xlu0 %342 }
  0xa9   : > { %v346_v42 = vpop.permute.xlu1 %345  ;;  %vm361_vm15 = vcmp.eq.s32.totalorder %v298_v17, %v343_v41 }
  0xaa   : > { %1503 = vmatmul.mubr.msk.f32.gmra.mxu0 %vm360_vm14, %v1705_v20  ;;  %vm362_vm1 = vcmp.eq.s32.totalorder %v298_v17, %v346_v42 }
  0xab   : > { %1505 = vmatprep.mubr.msk.f32.mxu0 %vm361_vm15, %v1705_v20 }
  0xae   : > { %1506 = vmatmul.mubr.msk.f32.gmra.mxu0 %vm362_vm1, %v1705_v20 }
  0xd5   : > { %v659_v43 = vpop.xlane.xlu0 %658 }
  0xd6   : > { %v660_v44 = vrot.slane %v659_v43, 4 }
  0xd8   : > { %v661_v46 = vmax.f32 %v659_v43, %v660_v44 }
  0xda   : > { %v662_v47 = vrot.slane %v661_v46, 2 }
  0xdc   : > { %v663_v48 = vmax.f32 %v661_v46, %v662_v47 }
  0xde   : > { %v664_v49 = vrot.slane %v663_v48, 1 }
  0xe0   : > { %v665_v53 = vmax.f32 %v663_v48, %v664_v49 }
  0xe2   : > { %1564 = vpush %v665_v53 }
 0x113   : > { %s1565_s22 = spop %1564 }
 0x114   : > { %s1944_s23 = smax.f32 %s1565_s22, %s1941_s21 }
 0x115   : > { %s668_s24 = ssub.f32 %s1941_s21, %s1944_s23  ;;  %v673_v54 = vstv %s1944_s23  ;;  %p1010_p7 = scmp.gt.f32.partialorder %s1944_s23, %s1941_s21 }
 0x116   : > { %768 = sst [smem:[#allocation2]] %s1944_s23  ;;  %v689_v55 = vsub.f32 %v1909_v0, %v673_v54  ;;  %v681_v56 = vsub.f32 %v1861_v40, %v673_v54  ;;  %v688_v59 = vsub.f32 %v1906_v63, %v673_v54  ;;  %v674_v2 = vsub.f32 %v1840_v33, %v673_v54 }
 0x117   : > { %v669_v58 = vstv %s668_s24  ;;  %v687_v4 = vsub.f32 %v1903_v62, %v673_v54  ;;  %v686_v0 = vsub.f32 %v1892_v57, %v673_v54  ;;  %v676_v40 = vsub.f32 %v1846_v35, %v673_v54 }
 0x118   : > { %v670_v60 = vmul.f32 1.442695, %v669_v58  ;;  %v720_v61 = vmul.f32 1.442695, %v689_v55  ;;  %v704_v1 = vmul.f32 1.442695, %v681_v56  ;;  %v675_v63 = vsub.f32 %v1843_v34, %v673_v54 }
 0x119   : > { %v718_v3 = vmul.f32 1.442695, %v688_v59  ;;  %v690_v5 = vmul.f32 1.442695, %v674_v2  ;;  %v716_v6 = vmul.f32 1.442695, %v687_v4  ;;  %v685_v33 = vsub.f32 %v1889_v52, %v673_v54 }
 0x11a   : > { %1615 = vpow2.f32 %v670_v60  ;;  %v714_v7 = vmul.f32 1.442695, %v686_v0  ;;  %v677_v8 = vsub.f32 %v1849_v36, %v673_v54  ;;  %v694_v9 = vmul.f32 1.442695, %v676_v40 }
 0x11b   : > { %1617 = vpow2.f32 %v720_v61  ;;  %v678_v62 = vsub.f32 %v1852_v37, %v673_v54  ;;  %v692_v10 = vmul.f32 1.442695, %v675_v63  ;;  %v712_v12 = vmul.f32 1.442695, %v685_v33 }
 0x11c   : > { %1619 = vpow2.f32 %v704_v1  ;;  %v684_v57 = vsub.f32 %v1886_v51, %v673_v54  ;;  %v679_v34 = vsub.f32 %v1855_v38, %v673_v54  ;;  %v696_v35 = vmul.f32 1.442695, %v677_v8 }
 0x11d   : > { %1621 = vpow2.f32 %v718_v3  ;;  %v680_v36 = vsub.f32 %v1858_v39, %v673_v54  ;;  %v698_v37 = vmul.f32 1.442695, %v678_v62  ;;  %v683_v15 = vsub.f32 %v1883_v50, %v673_v54 }
 0x11e   : > { %1623 = vpow2.f32 %v690_v5  ;;  %v710_v52 = vmul.f32 1.442695, %v684_v57  ;;  %v700_v17 = vmul.f32 1.442695, %v679_v34  ;;  %v682_v38 = vsub.f32 %v1872_v45, %v673_v54  ;;  %v2004_v34 = vld [vmem:[%s243_s29] ss:$0 sm:$0xff] }
 0x11f   : > { %1625 = vpow2.f32 %v716_v6  ;;  %v702_v19 = vmul.f32 1.442695, %v680_v36  ;;  %v708_v39 = vmul.f32 1.442695, %v683_v15 }
 0x120   : > { %1627 = vpow2.f32 %v714_v7  ;;  %v706_v22 = vmul.f32 1.442695, %v682_v38 }
 0x121   : > { %1629 = vpow2.f32 %v694_v9 }
 0x122   : > { %1631 = vpow2.f32 %v692_v10  ;;  %v396_v10 = vshrl.u32 %v297_v16, 7 }
 0x123   : > { %1633 = vpow2.f32 %v712_v12 }
 0x124   : > { %1635 = vpow2.f32 %v696_v35  ;;  %v1997_v12 = vadd.s32 16, %v396_v10  ;;  %v1999_v57 = vadd.s32 24, %v396_v10  ;;  %v2018_v16 = vadd.s32 40, %v396_v10 }
 0x125   : > { %1637 = vpow2.f32 %v698_v37  ;;  %v2022_v35 = vadd.s32 48, %v396_v10  ;;  %v2030_v36 = vadd.s32 64, %v396_v10  ;;  %v2032_v37 = vadd.s32 72, %v396_v10 }
 0x126   : > { %1639 = vpow2.f32 %v710_v52  ;;  %vm418_vm3 = vcmp.eq.s32.totalorder %v1997_v12, %v2004_v34  ;;  %vm419_vm4 = vcmp.eq.s32.totalorder %v1999_v57, %v2004_v34  ;;  %vm421_vm6 = vcmp.eq.s32.totalorder %v2018_v16, %v2004_v34 }
 0x127   : > { %v1616_v11 = vpop.eup %1615  ;;  %1641 = vpow2.f32 %v700_v17  ;;  %vm422_vm7 = vcmp.eq.s32.totalorder %v2022_v35, %v2004_v34  ;;  %vm424_vm9 = vcmp.eq.s32.totalorder %v2030_v36, %v2004_v34  ;;  %vm425_vm10 = vcmp.eq.s32.totalorder %v2032_v37, %v2004_v34 }
 0x128   : > { %v1964_v13 = vpop.eup %1617  ;;  %1566 = vpush %v1616_v11  ;;  %1643 = vpow2.f32 %v702_v19  ;;  %v1995_v11 = vadd.s32 8, %v396_v10  ;;  %v2040_v15 = vadd.s32 80, %v396_v10  ;;  %v2054_v19 = vadd.s32 104, %v396_v10 }
 0x129   : > { %v1620_v14 = vpop.eup %1619  ;;  %846 = vperm.xlu1 %1614, %v1964_v13   ;;  %1645 = vpow2.f32 %v708_v39  ;;  %v753_v9 = vsel %vm626_vm0, %v1964_v13, 0.0  ;;  %v2006_v13 = vadd.s32 32, %v396_v10  ;;  %v2060_v39 = vadd.s32 112, %v396_v10 }
 0x12a   : > { %806 = vperm.xlu0 %1613, %v1620_v14   ;;  %v1970_v51 = vpop.eup %1621  ;;  %1647 = vpow2.f32 %v706_v22  ;;  %v737_v58 = vsel %vm626_vm0, %v1620_v14, 0.0  ;;  %vm417_vm2 = vcmp.eq.s32.totalorder %v1995_v11, %v2004_v34  ;;  %v2024_v14 = vadd.s32 56, %v396_v10 }
 0x12b   : > { %v1624_v18 = vpop.eup %1623  ;;  %v751_v33 = vsel %vm626_vm0, %v1970_v51, 0.0  ;;  %vm420_vm5 = vcmp.eq.s32.totalorder %v2006_v13, %v2004_v34  ;;  %vm426_vm11 = vcmp.eq.s32.totalorder %v2040_v15, %v2004_v34  ;;  %vm429_vm14 = vcmp.eq.s32.totalorder %v2054_v19, %v2004_v34 }
 0x12c   : > { %v1626_v21 = vpop.eup %1625  ;;  %v724_v24 = vsel %vm626_vm0, %v1624_v18, 0.0  ;;  %vm423_vm8 = vcmp.eq.s32.totalorder %v2024_v14, %v2004_v34  ;;  %v2064_v22 = vadd.s32 120, %v396_v10  ;;  %vm430_vm15 = vcmp.eq.s32.totalorder %v2060_v39, %v2004_v34 }
 0x12d   : > { %841 = vperm.xlu1 %1614, %v1970_v51   ;;  %v1628_v50 = vpop.eup %1627  ;;  %v749_v63 = vsel %vm626_vm0, %v1626_v21, 0.0  ;;  %v2042_v51 = vadd.s32 88, %v396_v10 }
 0x12e   : > { %771 = vperm.xlu0 %1613, %v1624_v18   ;;  %v1630_v23 = vpop.eup %1629  ;;  %v747_v0 = vsel %vm626_vm0, %v1628_v50, 0.0  ;;  %v2050_v18 = vadd.s32 96, %v396_v10  ;;  %vm431_vm1 = vcmp.eq.s32.totalorder %v2064_v22, %v2004_v34 }
 0x12f   : > { %v1632_v25 = vpop.eup %1631  ;;  %v727_v29 = vsel %vm626_vm0, %v1630_v23, 0.0  ;;  %vm427_vm12 = vcmp.eq.s32.totalorder %v2042_v51, %v2004_v34 }
 0x130   : > { %v1634_v26 = vpop.eup %1633  ;;  %v725_v45 = vsel %vm626_vm0, %v1632_v25, 0.0  ;;  %vm428_vm13 = vcmp.eq.s32.totalorder %v2050_v18, %v2004_v34 }
 0x131   : > { %836 = vperm.xlu1 %1614, %v1626_v21   ;;  %v1636_v27 = vpop.eup %1635  ;;  %v726_v28 = vadd.f32 %v725_v45, %v724_v24  ;;  %v745_v5 = vsel %vm626_vm0, %v1634_v26, 0.0 }
 0x132   : > { %v1638_v30 = vpop.eup %1637  ;;  %v729_v41 = vsel %vm626_vm0, %v1636_v27, 0.0 }
 0x133   : > { %v728_v31 = vadd.f32 %v727_v29, %v726_v28  ;;  %v1640_v32 = vpop.eup %1639  ;;  %v731_v44 = vsel %vm626_vm0, %v1638_v30, 0.0 }
 0x134   : > { %v1642_v42 = vpop.eup %1641  ;;  %v743_v3 = vsel %vm626_vm0, %v1640_v32, 0.0 }
 0x135   : > { %831 = vperm.xlu1 %1614, %v1628_v50   ;;  %v730_v43 = vadd.f32 %v729_v41, %v728_v31  ;;  %v1644_v46 = vpop.eup %1643  ;;  %v733_v49 = vsel %vm626_vm0, %v1642_v42, 0.0 }
 0x136   : > { %v1646_v48 = vpop.eup %1645  ;;  %v735_v54 = vsel %vm626_vm0, %v1644_v46, 0.0 }
 0x137   : > { %v732_v47 = vadd.f32 %v731_v44, %v730_v43  ;;  %v1648_v55 = vpop.eup %1647  ;;  %v741_v1 = vsel %vm626_vm0, %v1646_v48, 0.0 }
 0x138   : > { %v739_v60 = vsel %vm626_vm0, %v1648_v55, 0.0  ;;  %vm416_vm0 = vcmp.eq.s32.totalorder %v396_v10, %v2004_v34 }
 0x139   : > { %826 = vperm.xlu1 %1614, %v1634_v26   ;;  %v734_v53 = vadd.f32 %v733_v49, %v732_v47  ;;  %1540 = vmatprep.mubr.msk.f32.mxu1 %vm416_vm0, %v1705_v20 }
 0x13b   : > { %v736_v56 = vadd.f32 %v735_v54, %v734_v53 }
 0x13d   : > { %821 = vperm.xlu1 %1614, %v1640_v32   ;;  %v738_v59 = vadd.f32 %v737_v58, %v736_v56 }
 0x13f   : > { %v740_v61 = vadd.f32 %v739_v60, %v738_v59 }
 0x141   : > { %816 = vperm.xlu1 %1614, %v1646_v48   ;;  %v742_v2 = vadd.f32 %v741_v1, %v740_v61 }
 0x143   : > { %v744_v4 = vadd.f32 %v743_v3, %v742_v2 }
 0x145   : > { %811 = vperm.xlu1 %1614, %v1648_v55   ;;  %v746_v6 = vadd.f32 %v745_v5, %v744_v4 }
 0x147   : > { %v748_v40 = vadd.f32 %v747_v0, %v746_v6 }
 0x149   : > { %801 = vperm.xlu1 %1614, %v1644_v46   ;;  %v750_v7 = vadd.f32 %v749_v63, %v748_v40 }
 0x14b   : > { %v752_v8 = vadd.f32 %v751_v33, %v750_v7 }
 0x14d   : > { %796 = vperm.xlu1 %1614, %v1642_v42   ;;  %v754_v62 = vadd.f32 %v753_v9, %v752_v8 }
 0x151   : > { %791 = vperm.xlu1 %1614, %v1638_v30  }
 0x152   : > { %v2036_v52 = vpop.f32.mrf.mxu0 }
 0x154   : > { %v2046_v17 = vpop.f32.mrf.mxu0 }
 0x155   : > { %786 = vperm.xlu1 %1614, %v1636_v27  }
 0x156   : > { %v2052_v38 = vpop.f32.mrf.mxu0 }
 0x158   : > { %v2062_v21 = vpop.f32.mrf.mxu0 }
 0x159   : > { %781 = vperm.xlu1 %1614, %v1630_v23   ;;  %s2134_s6 = spop %1566 }
 0x15a   : > { %v1492_v50 = vpop.f32.mrf.mxu0  ;;  %s723_s7 = smul.f32 %s2134_s6, %s722_s5 }
 0x15c   : > { %v566_v23 = vpop.f32.mrf.mxu0 }
 0x15d   : > { %776 = vperm.xlu1 %1614, %v1632_v25  }
 0x15e   : > { %v1495_v24 = vpop.f32.mrf.mxu0 }
 0x160   : > { %v576_v25 = vpop.f32.mrf.mxu0 }
 0x162   : > { %v1498_v26 = vpop.f32.mrf.mxu0 }
 0x164   : > { %v586_v45 = vpop.f32.mrf.mxu0 }
 0x166   : > { %v1501_v27 = vpop.f32.mrf.mxu0 }
 0x168   : > { %v596_v28 = vpop.f32.mrf.mxu0 }
 0x16a   : > { %v1504_v29 = vpop.f32.mrf.mxu0 }
 0x16c   : > { %v606_v30 = vpop.f32.mrf.mxu0 }
 0x16e   : > { %v1507_v31 = vpop.f32.mrf.mxu0 }
 0x170   : > { %v616_v42 = vpop.f32.mrf.mxu0 }
 0x181   : > { %755 = vadd.xlane.f32.xlu1 %v754_v62 }
 0x1a4   : > { %v847_v32 = vpop.permute.xlu1 %846 }
 0x1a5   : > { %v864_v41 = vmul.f32 %v1507_v31, %v847_v32  ;;  %v807_v60 = vpop.permute.xlu0 %806 }
 0x1a6   : > { %v856_v2 = vmul.f32 %v1495_v24, %v807_v60 }
 0x1a7   : > { %1508 = vmatprep.subr.mxu1 %v864_v41 }
 0x1a8   : > { %1509 = vmatpush3.msra.mxu1 %v864_v41  ;;  %v842_v43 = vpop.permute.xlu1 %841 }
 0x1a9   : > { %v863_v44 = vmul.f32 %v842_v43, %v616_v42  ;;  %v772_v9 = vpop.permute.xlu0 %771 }
 0x1ab   : > { %1510 = vmatprep.subr.mxu1 %v863_v44 }
 0x1ac   : > { %1511 = vmatpush3.msra.mxu1 %v863_v44  ;;  %v837_v46 = vpop.permute.xlu1 %836 }
 0x1ad   : > { %v862_v47 = vmul.f32 %v1504_v29, %v837_v46 }
 0x1af   : > { %1512 = vmatprep.subr.mxu1 %v862_v47 }
 0x1b0   : > { %1513 = vmatpush3.msra.mxu1 %v862_v47  ;;  %v832_v48 = vpop.permute.xlu1 %831 }
 0x1b1   : > { %v861_v49 = vmul.f32 %v832_v48, %v606_v30 }
 0x1b3   : > { %1514 = vmatprep.subr.mxu1 %v861_v49 }
 0x1b4   : > { %1515 = vmatpush3.msra.mxu1 %v861_v49  ;;  %v827_v53 = vpop.permute.xlu1 %826 }
 0x1b5   : > { %v860_v54 = vmul.f32 %v1501_v27, %v827_v53 }
 0x1b7   : > { %1516 = vmatprep.subr.mxu1 %v860_v54 }
 0x1b8   : > { %1517 = vmatpush3.msra.mxu1 %v860_v54  ;;  %v822_v55 = vpop.permute.xlu1 %821 }
 0x1b9   : > { %v859_v56 = vmul.f32 %v822_v55, %v596_v28 }
 0x1bb   : > { %1518 = vmatprep.subr.mxu1 %v859_v56 }
 0x1bc   : > { %1519 = vmatpush3.msra.mxu1 %v859_v56  ;;  %v817_v58 = vpop.permute.xlu1 %816 }
 0x1bd   : > { %v858_v59 = vmul.f32 %v1498_v26, %v817_v58 }
 0x1bf   : > { %1520 = vmatprep.subr.mxu1 %v858_v59 }
 0x1c0   : > { %1521 = vmatpush3.msra.mxu1 %v858_v59  ;;  %v812_v61 = vpop.permute.xlu1 %811 }
 0x1c1   : > { %v857_v1 = vmul.f32 %v812_v61, %v586_v45 }
 0x1c3   : > { %1522 = vmatprep.subr.mxu1 %v857_v1 }
 0x1c4   : > { %1523 = vmatpush3.msra.mxu1 %v857_v1  ;;  %v802_v3 = vpop.permute.xlu1 %801 }
 0x1c5   : > { %v855_v4 = vmul.f32 %v802_v3, %v576_v25  ;;  %1524 = vmatprep.subr.mxu1 %v856_v2 }
 0x1c6   : > { %1525 = vmatpush3.msra.mxu1 %v856_v2 }
 0x1c7   : > { %1526 = vmatprep.subr.mxu1 %v855_v4 }
 0x1c8   : > { %1527 = vmatpush3.msra.mxu1 %v855_v4  ;;  %v797_v5 = vpop.permute.xlu1 %796 }
 0x1c9   : > { %v854_v6 = vmul.f32 %v1492_v50, %v797_v5  ;;  %v849_v50 = vmul.f32 %v772_v9, %v2046_v17 }
 0x1cb   : > { %1528 = vmatprep.subr.mxu1 %v854_v6 }
 0x1cc   : > { %1529 = vmatpush3.msra.mxu1 %v854_v6  ;;  %v792_v0 = vpop.permute.xlu1 %791 }
 0x1cd   : > { %v853_v40 = vmul.f32 %v792_v0, %v566_v23 }
 0x1cf   : > { %1530 = vmatprep.subr.mxu1 %v853_v40 }
 0x1d0   : > { %1531 = vmatpush3.msra.mxu1 %v853_v40  ;;  %v787_v63 = vpop.permute.xlu1 %786 }
 0x1d1   : > { %v852_v7 = vmul.f32 %v2052_v38, %v787_v63 }
 0x1d3   : > { %1532 = vmatprep.subr.mxu1 %v852_v7 }
 0x1d4   : > { %1533 = vmatpush3.msra.mxu1 %v852_v7  ;;  %v782_v33 = vpop.permute.xlu1 %781 }
 0x1d5   : > { %v851_v8 = vmul.f32 %v782_v33, %v2062_v21 }
 0x1d7   : > { %1534 = vmatprep.subr.mxu1 %v851_v8 }
 0x1d8   : > { %1535 = vmatpush3.msra.mxu1 %v851_v8  ;;  %v777_v62 = vpop.permute.xlu1 %776 }
 0x1d9   : > { %v850_v10 = vmul.f32 %v2036_v52, %v777_v62 }
 0x1db   : > { %1536 = vmatprep.subr.mxu1 %v850_v10 }
 0x1dc   : > { %1537 = vmatpush3.msra.mxu1 %v850_v10 }
 0x1dd   : > { %1538 = vmatprep.subr.mxu1 %v849_v50 }
 0x1de   : > { %1539 = vmatpush3.msra.mxu1 %v849_v50 }
 0x1df   : > { %1541 = vmatmul.mubr.msk.f32.vlgmr.msra.gmra.mxu1 %vm417_vm2, %v1705_v20 }
 0x1e0   : > { %1543 = vmatprep.mubr.msk.f32.mxu1 %vm418_vm3, %v1705_v20 }
 0x1e3   : > { %1544 = vmatmul.mubr.msk.f32.gmra.mxu1 %vm419_vm4, %v1705_v20 }
 0x1e4   : > { %1546 = vmatprep.mubr.msk.f32.mxu1 %vm420_vm5, %v1705_v20 }
 0x1e7   : > { %1547 = vmatmul.mubr.msk.f32.gmra.mxu1 %vm421_vm6, %v1705_v20 }
 0x1e8   : > { %1549 = vmatprep.mubr.msk.f32.mxu1 %vm422_vm7, %v1705_v20 }
 0x1eb   : > { %1550 = vmatmul.mubr.msk.f32.gmra.mxu1 %vm423_vm8, %v1705_v20 }
 0x1ec   : > { %1552 = vmatprep.mubr.msk.f32.mxu1 %vm424_vm9, %v1705_v20 }
 0x1ef   : > { %1553 = vmatmul.mubr.msk.f32.gmra.mxu1 %vm425_vm10, %v1705_v20 }
 0x1f0   : > { %1555 = vmatprep.mubr.msk.f32.mxu1 %vm426_vm11, %v1705_v20 }
 0x1f3   : > { %1556 = vmatmul.mubr.msk.f32.gmra.mxu1 %vm427_vm12, %v1705_v20 }
 0x1f4   : > { %1558 = vmatprep.mubr.msk.f32.mxu1 %vm428_vm13, %v1705_v20 }
 0x1f7   : > { %1559 = vmatmul.mubr.msk.f32.gmra.mxu1 %vm429_vm14, %v1705_v20 }
 0x1f8   : > { %1561 = vmatprep.mubr.msk.f32.mxu1 %vm430_vm15, %v1705_v20 }
 0x1fb   : > { %1562 = vmatmul.mubr.msk.f32.gmra.mxu1 %vm431_vm1, %v1705_v20 }
 0x20a   : > { %v756_v11 = vpop.xlane.xlu1 %755 }
 0x20b   : > { %v757_v12 = vrot.slane %v756_v11, 4 }
 0x20d   : > { %v758_v57 = vadd.f32 %v757_v12, %v756_v11 }
 0x20f   : > { %v759_v13 = vrot.slane %v758_v57, 2 }
 0x211   : > { %v760_v16 = vadd.f32 %v759_v13, %v758_v57 }
 0x213   : > { %v761_v35 = vrot.slane %v760_v16, 1 }
 0x215   : > { %v762_v14 = vadd.f32 %v761_v35, %v760_v16 }
 0x217   : > { %1568 = vpush %v762_v14 }
 0x248   : > { %s1569_s8 = spop %1568 }
 0x249   : > { %s764_s9 = sadd.f32 %s1569_s8, %s723_s7 }
 0x24b   : > { %766 = sst [smem:[#allocation3]] %s764_s9 }
 0x29f   : > { %v2137_v36 = vpop.f32.mrf.mxu1 }
 0x2a1   : > { %v2139_v34 = vpop.f32.mrf.mxu1 }
 0x2a3   : > { %v2141_v20 = vpop.f32.mrf.mxu1 }
 0x2a5   : > { %v2143_v37 = vpop.f32.mrf.mxu1 }
 0x2a7   : > { %v2145_v52 = vpop.f32.mrf.mxu1 }
 0x2a9   : > { %v2147_v15 = vpop.f32.mrf.mxu1 }
 0x2ab   : > { %v2149_v51 = vpop.f32.mrf.mxu1 }
 0x2ad   : > { %v2151_v17 = vpop.f32.mrf.mxu1 }
 0x2af   : > { %v2153_v18 = vpop.f32.mrf.mxu1 }
 0x2b1   : > { %v2155_v38 = vpop.f32.mrf.mxu1 }
 0x2b3   : > { %v2157_v19 = vpop.f32.mrf.mxu1 }
 0x2b5   : > { %v2159_v39 = vpop.f32.mrf.mxu1 }
 0x2b7   : > { %v2161_v21 = vpop.f32.mrf.mxu1 }
 0x2b9   : > { %v2163_v22 = vpop.f32.mrf.mxu1  ;;  %1013 = sbr.rel (%p1316_p4) target bundleno = 710 (0x2c6), region = 44 }
 0x2bb   : > { %v2165_v23 = vpop.f32.mrf.mxu1 }
 0x2bd   : > { %v2167_v24 = vpop.f32.mrf.mxu1 }
 0x2be   : > { %1014 = vst [vmem:[#allocation4] sm:$0xff] %v2139_v34  ;;  %1015 = vst [vmem:[#allocation4 + $0x8] sm:$0xff] %v2137_v36 }
 0x2bf   : > { %1016 = vst [vmem:[#allocation4 + $0x10] sm:$0xff] %v2143_v37  ;;  %1017 = vst [vmem:[#allocation4 + $0x18] sm:$0xff] %v2141_v20 }
 0x2c0   : > { %1018 = vst [vmem:[#allocation4 + $0x20] sm:$0xff] %v2147_v15  ;;  %1019 = vst [vmem:[#allocation4 + $0x28] sm:$0xff] %v2145_v52 }
 0x2c1   : > { %1020 = vst [vmem:[#allocation4 + $0x30] sm:$0xff] %v2151_v17  ;;  %1021 = vst [vmem:[#allocation4 + $0x38] sm:$0xff] %v2149_v51 }
 0x2c2   : > { %1022 = vst [vmem:[#allocation4 + $0x40] sm:$0xff] %v2155_v38  ;;  %1023 = vst [vmem:[#allocation4 + $0x48] sm:$0xff] %v2153_v18 }
 0x2c3   : > { %1024 = vst [vmem:[#allocation4 + $0x50] sm:$0xff] %v2159_v39  ;;  %1025 = vst [vmem:[#allocation4 + $0x58] sm:$0xff] %v2157_v19 }
 0x2c4   : > { %1026 = vst [vmem:[#allocation4 + $0x60] sm:$0xff] %v2163_v22  ;;  %1027 = vst [vmem:[#allocation4 + $0x68] sm:$0xff] %v2161_v21 }
 0x2c5   : > { %1028 = vst [vmem:[#allocation4 + $0x70] sm:$0xff] %v2167_v24  ;;  %1029 = vst [vmem:[#allocation4 + $0x78] sm:$0xff] %v2165_v23 }
 0x2c6 PF: > { %p1031_p9 = pnand %p1316_p4, %p1010_p7 }
 0x2c8   : > { %1034 = sbr.rel (%p1031_p9) target bundleno = 731 (0x2db), region = 48 }
 0x2cd   : > { %v1035_v25 = vld [vmem:[#allocation4] sm:$0xff]  ;;  %v1051_v26 = vstv %s2134_s6  ;;  %v1036_v45 = vld [vmem:[#allocation4 + $0x8] sm:$0xff]  ;;  %v1037_v27 = vld [vmem:[#allocation4 + $0x10] sm:$0xff] }
 0x2ce   : > { %v1052_v28 = vmul.f32 %v1051_v26, %v1035_v25  ;;  %v1053_v29 = vmul.f32 %v1051_v26, %v1036_v45  ;;  %v1054_v30 = vmul.f32 %v1051_v26, %v1037_v27  ;;  %v1038_v31 = vld [vmem:[#allocation4 + $0x18] sm:$0xff]  ;;  %v1039_v32 = vld [vmem:[#allocation4 + $0x20] sm:$0xff]  ;;  %v1040_v41 = vld [vmem:[#allocation4 + $0x28] sm:$0xff] }
 0x2cf   : > { %v1055_v42 = vmul.f32 %v1051_v26, %v1038_v31  ;;  %v1056_v43 = vmul.f32 %v1051_v26, %v1039_v32  ;;  %v1057_v44 = vmul.f32 %v1051_v26, %v1040_v41  ;;  %v1041_v46 = vld [vmem:[#allocation4 + $0x30] sm:$0xff]  ;;  %v1042_v47 = vld [vmem:[#allocation4 + $0x38] sm:$0xff]  ;;  %v1043_v48 = vld [vmem:[#allocation4 + $0x40] sm:$0xff] }
 0x2d0   : > { %v1068_v49 = vadd.f32 %v1052_v28, %v2139_v34  ;;  %v1069_v53 = vadd.f32 %v2137_v36, %v1053_v29  ;;  %v1070_v54 = vadd.f32 %v1054_v30, %v2143_v37  ;;  %v1058_v55 = vmul.f32 %v1051_v26, %v1041_v46  ;;  %v1044_v56 = vld [vmem:[#allocation4 + $0x48] sm:$0xff]  ;;  %v1045_v58 = vld [vmem:[#allocation4 + $0x50] sm:$0xff]  ;;  %v1046_v59 = vld [vmem:[#allocation4 + $0x58] sm:$0xff] }
 0x2d1   : > { %v1071_v60 = vadd.f32 %v2141_v20, %v1055_v42  ;;  %v1072_v61 = vadd.f32 %v1056_v43, %v2147_v15  ;;  %v1073_v1 = vadd.f32 %v2145_v52, %v1057_v44  ;;  %v1059_v2 = vmul.f32 %v1051_v26, %v1042_v47  ;;  %v1047_v3 = vld [vmem:[#allocation4 + $0x60] sm:$0xff]  ;;  %v1048_v4 = vld [vmem:[#allocation4 + $0x68] sm:$0xff]  ;;  %v1049_v5 = vld [vmem:[#allocation4 + $0x70] sm:$0xff] }
 0x2d2   : > { %1084 = vst [vmem:[#allocation4] sm:$0xff] %v1068_v49  ;;  %1085 = vst [vmem:[#allocation4 + $0x8] sm:$0xff] %v1069_v53  ;;  %v1074_v6 = vadd.f32 %v1058_v55, %v2151_v17  ;;  %v1060_v0 = vmul.f32 %v1051_v26, %v1043_v48  ;;  %v1061_v40 = vmul.f32 %v1051_v26, %v1044_v56  ;;  %v1050_v7 = vld [vmem:[#allocation4 + $0x78] sm:$0xff] }
 0x2d3   : > { %1086 = vst [vmem:[#allocation4 + $0x10] sm:$0xff] %v1070_v54  ;;  %v1062_v63 = vmul.f32 %v1051_v26, %v1045_v58  ;;  %1087 = vst [vmem:[#allocation4 + $0x18] sm:$0xff] %v1071_v60  ;;  %v1075_v33 = vadd.f32 %v2149_v51, %v1059_v2  ;;  %v1063_v8 = vmul.f32 %v1051_v26, %v1046_v59 }
 0x2d4   : > { %1088 = vst [vmem:[#allocation4 + $0x20] sm:$0xff] %v1072_v61  ;;  %1089 = vst [vmem:[#allocation4 + $0x28] sm:$0xff] %v1073_v1  ;;  %v1064_v9 = vmul.f32 %v1051_v26, %v1047_v3  ;;  %v1065_v62 = vmul.f32 %v1051_v26, %v1048_v4  ;;  %v1076_v10 = vadd.f32 %v1060_v0, %v2155_v38 }
 0x2d5   : > { %1090 = vst [vmem:[#allocation4 + $0x30] sm:$0xff] %v1074_v6  ;;  %v1077_v50 = vadd.f32 %v2153_v18, %v1061_v40  ;;  %v1078_v11 = vadd.f32 %v1062_v63, %v2159_v39  ;;  %v1066_v12 = vmul.f32 %v1051_v26, %v1049_v5  ;;  %1091 = vst [vmem:[#allocation4 + $0x38] sm:$0xff] %v1075_v33 }
 0x2d6   : > { %v1079_v57 = vadd.f32 %v2157_v19, %v1063_v8  ;;  %v1080_v13 = vadd.f32 %v1064_v9, %v2163_v22  ;;  %v1081_v16 = vadd.f32 %v2161_v21, %v1065_v62  ;;  %v1067_v35 = vmul.f32 %v1051_v26, %v1050_v7  ;;  %1092 = vst [vmem:[#allocation4 + $0x40] sm:$0xff] %v1076_v10 }
 0x2d7   : > { %1093 = vst [vmem:[#allocation4 + $0x48] sm:$0xff] %v1077_v50  ;;  %1094 = vst [vmem:[#allocation4 + $0x50] sm:$0xff] %v1078_v11  ;;  %v1082_v14 = vadd.f32 %v1066_v12, %v2167_v24 }
 0x2d8   : > { %1095 = vst [vmem:[#allocation4 + $0x58] sm:$0xff] %v1079_v57  ;;  %1096 = vst [vmem:[#allocation4 + $0x60] sm:$0xff] %v1080_v13  ;;  %v1083_v25 = vadd.f32 %v2165_v23, %v1067_v35 }
 0x2d9   : > { %1097 = vst [vmem:[#allocation4 + $0x68] sm:$0xff] %v1081_v16  ;;  %1098 = vst [vmem:[#allocation4 + $0x70] sm:$0xff] %v1082_v14 }
 0x2da   : > { %1099 = vst [vmem:[#allocation4 + $0x78] sm:$0xff] %v1083_v25 }
 0x2db PF: > { %p1100_p10 = pneg %p1010_p7 }
 0x2dd   : > { %p1101_p11 = pnand %p1316_p4, %p1100_p10 }
 0x2df   : > { %1104 = sbr.rel (%p1101_p11) target bundleno = 751 (0x2ef), region = 52 }
 0x2e4   : > { %v1105_v26 = vld [vmem:[#allocation4] sm:$0xff]  ;;  %v1106_v45 = vld [vmem:[#allocation4 + $0x8] sm:$0xff]  ;;  %v1107_v27 = vld [vmem:[#allocation4 + $0x10] sm:$0xff] }
 0x2e5   : > { %v1121_v28 = vadd.f32 %v1105_v26, %v2139_v34  ;;  %v1122_v29 = vadd.f32 %v2137_v36, %v1106_v45  ;;  %v1123_v30 = vadd.f32 %v1107_v27, %v2143_v37  ;;  %v1108_v31 = vld [vmem:[#allocation4 + $0x18] sm:$0xff]  ;;  %v1109_v32 = vld [vmem:[#allocation4 + $0x20] sm:$0xff]  ;;  %v1110_v41 = vld [vmem:[#allocation4 + $0x28] sm:$0xff] }
 0x2e6   : > { %v1124_v42 = vadd.f32 %v2141_v20, %v1108_v31  ;;  %v1125_v43 = vadd.f32 %v1109_v32, %v2147_v15  ;;  %v1126_v44 = vadd.f32 %v2145_v52, %v1110_v41  ;;  %v1111_v46 = vld [vmem:[#allocation4 + $0x30] sm:$0xff]  ;;  %v1112_v47 = vld [vmem:[#allocation4 + $0x38] sm:$0xff]  ;;  %v1113_v48 = vld [vmem:[#allocation4 + $0x40] sm:$0xff] }
 0x2e7   : > { %1137 = vst [vmem:[#allocation4] sm:$0xff] %v1121_v28  ;;  %1138 = vst [vmem:[#allocation4 + $0x8] sm:$0xff] %v1122_v29  ;;  %v1127_v34 = vadd.f32 %v1111_v46, %v2151_v17  ;;  %v1128_v36 = vadd.f32 %v2149_v51, %v1112_v47  ;;  %v1129_v37 = vadd.f32 %v1113_v48, %v2155_v38  ;;  %v1114_v49 = vld [vmem:[#allocation4 + $0x48] sm:$0xff]  ;;  %v1115_v53 = vld [vmem:[#allocation4 + $0x50] sm:$0xff] }
 0x2e8   : > { %1139 = vst [vmem:[#allocation4 + $0x10] sm:$0xff] %v1123_v30  ;;  %v1116_v54 = vld [vmem:[#allocation4 + $0x58] sm:$0xff]  ;;  %1140 = vst [vmem:[#allocation4 + $0x18] sm:$0xff] %v1124_v42  ;;  %v1130_v20 = vadd.f32 %v2153_v18, %v1114_v49  ;;  %v1131_v52 = vadd.f32 %v1115_v53, %v2159_v39  ;;  %v1117_v55 = vld [vmem:[#allocation4 + $0x60] sm:$0xff] }
 0x2e9   : > { %1141 = vst [vmem:[#allocation4 + $0x20] sm:$0xff] %v1125_v43  ;;  %1142 = vst [vmem:[#allocation4 + $0x28] sm:$0xff] %v1126_v44  ;;  %v1132_v15 = vadd.f32 %v2157_v19, %v1116_v54  ;;  %v1118_v56 = vld [vmem:[#allocation4 + $0x68] sm:$0xff]  ;;  %v1119_v58 = vld [vmem:[#allocation4 + $0x70] sm:$0xff]  ;;  %v1133_v51 = vadd.f32 %v1117_v55, %v2163_v22 }
 0x2ea   : > { %1143 = vst [vmem:[#allocation4 + $0x30] sm:$0xff] %v1127_v34  ;;  %1144 = vst [vmem:[#allocation4 + $0x38] sm:$0xff] %v1128_v36  ;;  %v1134_v17 = vadd.f32 %v2161_v21, %v1118_v56  ;;  %v1135_v38 = vadd.f32 %v1119_v58, %v2167_v24  ;;  %v1120_v59 = vld [vmem:[#allocation4 + $0x78] sm:$0xff] }
 0x2eb   : > { %1145 = vst [vmem:[#allocation4 + $0x40] sm:$0xff] %v1129_v37  ;;  %1146 = vst [vmem:[#allocation4 + $0x48] sm:$0xff] %v1130_v20  ;;  %v1136_v18 = vadd.f32 %v2165_v23, %v1120_v59 }
 0x2ec   : > { %1147 = vst [vmem:[#allocation4 + $0x50] sm:$0xff] %v1131_v52  ;;  %1148 = vst [vmem:[#allocation4 + $0x58] sm:$0xff] %v1132_v15 }
 0x2ed   : > { %1149 = vst [vmem:[#allocation4 + $0x60] sm:$0xff] %v1133_v51  ;;  %1150 = vst [vmem:[#allocation4 + $0x68] sm:$0xff] %v1134_v17 }
 0x2ee   : > { %1151 = vst [vmem:[#allocation4 + $0x70] sm:$0xff] %v1135_v38  ;;  %1152 = vst [vmem:[#allocation4 + $0x78] sm:$0xff] %v1136_v18 }
 0x2ef PF: > { %p1383_p12 = scmp.ne.s32.totalorder %s1693_s15, 2 }
 0x2f0   : > { %s1173_s10 = sld [smem:[#allocation3]] (!%p1383_p12) }
 0x2f1   : > { %1156 = sbr.rel (%p1383_p12) target bundleno = 835 (0x343), region = 56 }
 0x2f6   : > { %v1174_v19 = vstv %s1173_s10  ;;  %v1157_v21 = vld [vmem:[#allocation4] sm:$0xff]  ;;  %v1158_v22 = vld [vmem:[#allocation4 + $0x8] sm:$0xff]  ;;  %v1159_v24 = vld [vmem:[#allocation4 + $0x10] sm:$0xff] }
 0x2f7   : > { %1649 = vrcp.f32 %v1174_v19  ;;  %v1160_v60 = vld [vmem:[#allocation4 + $0x18] sm:$0xff]  ;;  %v1161_v61 = vld [vmem:[#allocation4 + $0x20] sm:$0xff]  ;;  %v1162_v1 = vld [vmem:[#allocation4 + $0x28] sm:$0xff] }
 0x2f8   : > { %v1163_v23 = vld [vmem:[#allocation4 + $0x30] sm:$0xff]  ;;  %v1164_v2 = vld [vmem:[#allocation4 + $0x38] sm:$0xff]  ;;  %v1165_v3 = vld [vmem:[#allocation4 + $0x40] sm:$0xff] }
 0x2f9   : > { %v1166_v4 = vld [vmem:[#allocation4 + $0x48] sm:$0xff]  ;;  %v1167_v5 = vld [vmem:[#allocation4 + $0x50] sm:$0xff]  ;;  %v1168_v6 = vld [vmem:[#allocation4 + $0x58] sm:$0xff] }
 0x2fa   : > { %v1169_v0 = vld [vmem:[#allocation4 + $0x60] sm:$0xff]  ;;  %v1170_v63 = vld [vmem:[#allocation4 + $0x68] sm:$0xff]  ;;  %v1171_v7 = vld [vmem:[#allocation4 + $0x70] sm:$0xff] }
 0x2fb   : > { %v1172_v33 = vld [vmem:[#allocation4 + $0x78] sm:$0xff] }
 0x304   : > { %v1650_v39 = vpop.eup %1649 }
 0x305   : > { %1570 = vpush %v1650_v39 }
 0x336   : > { %s1571_s11 = spop %1570 }
 0x337   : > { %v1177_v40 = vstv %s1571_s11 }
 0x338   : > { %v1178_v8 = vmul.f32 %v1177_v40, %v1157_v21  ;;  %v1179_v9 = vmul.f32 %v1177_v40, %v1158_v22  ;;  %v1180_v62 = vmul.f32 %v1177_v40, %v1159_v24  ;;  %v1181_v10 = vmul.f32 %v1177_v40, %v1160_v60 }
 0x339   : > { %v1182_v50 = vmul.f32 %v1177_v40, %v1161_v61  ;;  %v1183_v11 = vmul.f32 %v1177_v40, %v1162_v1  ;;  %v1184_v12 = vmul.f32 %v1177_v40, %v1163_v23  ;;  %v1185_v57 = vmul.f32 %v1177_v40, %v1164_v2 }
 0x33a   : > { %v1186_v13 = vmul.f32 %v1177_v40, %v1165_v3  ;;  %v1187_v16 = vmul.f32 %v1177_v40, %v1166_v4  ;;  %v1188_v35 = vmul.f32 %v1177_v40, %v1167_v5  ;;  %v1189_v14 = vmul.f32 %v1177_v40, %v1168_v6  ;;  %1194 = vst [vmem:[#allocation4] sm:$0xff] %v1178_v8 }
 0x33b   : > { %1195 = vst [vmem:[#allocation4 + $0x8] sm:$0xff] %v1179_v9  ;;  %1196 = vst [vmem:[#allocation4 + $0x10] sm:$0xff] %v1180_v62  ;;  %v1190_v25 = vmul.f32 %v1177_v40, %v1169_v0  ;;  %v1191_v26 = vmul.f32 %v1177_v40, %v1170_v63  ;;  %v1192_v45 = vmul.f32 %v1177_v40, %v1171_v7 }
 0x33c   : > { %1197 = vst [vmem:[#allocation4 + $0x18] sm:$0xff] %v1181_v10  ;;  %v1193_v27 = vmul.f32 %v1177_v40, %v1172_v33  ;;  %1198 = vst [vmem:[#allocation4 + $0x20] sm:$0xff] %v1182_v50 }
 0x33d   : > { %1199 = vst [vmem:[#allocation4 + $0x28] sm:$0xff] %v1183_v11  ;;  %1200 = vst [vmem:[#allocation4 + $0x30] sm:$0xff] %v1184_v12 }
 0x33e   : > { %1201 = vst [vmem:[#allocation4 + $0x38] sm:$0xff] %v1185_v57  ;;  %1202 = vst [vmem:[#allocation4 + $0x40] sm:$0xff] %v1186_v13 }
 0x33f   : > { %1203 = vst [vmem:[#allocation4 + $0x48] sm:$0xff] %v1187_v16  ;;  %1204 = vst [vmem:[#allocation4 + $0x50] sm:$0xff] %v1188_v35 }
 0x340   : > { %1205 = vst [vmem:[#allocation4 + $0x58] sm:$0xff] %v1189_v14  ;;  %1206 = vst [vmem:[#allocation4 + $0x60] sm:$0xff] %v1190_v25 }
 0x341   : > { %1207 = vst [vmem:[#allocation4 + $0x68] sm:$0xff] %v1191_v26  ;;  %1208 = vst [vmem:[#allocation4 + $0x70] sm:$0xff] %v1192_v45 }
 0x342   : > { %1209 = vst [vmem:[#allocation4 + $0x78] sm:$0xff] %v1193_v27 }
 0x343 PF: > { %p2233_p13 = scmp.eq.s32.totalorder %s1307_s18, 2  ;;  %s1707_s12 = smov [#allocation4]  }
 0x344   : > { %s1218_s13 = sshll.u32 %s1707_s12, 4  ;;  %s1219_s13 = int_to_ptr.vmem [resolvable:$true] %s1218_s13 }
 0x345   : > { %s1651_s30 = scalar_lea.vmem %s1219_s13, 2048  ;;  %p1658_p3 = scmp.lt.s32.totalorder %s1219_s13, %s1219_s13 }
 0x346   : > { %p1652_p0 = scmp.ne.s32.totalorder %s1219_s13, %s1651_s30  ;;  %p1659_p4 = scmp.lt.s32.totalorder %s1651_s30, %s1651_s30 }
 0x348   : > { %p1653_p1 = pnand %p1652_p0, %p2233_p13  ;;  %p1660_p5 = por %p1659_p4, %p1658_p3 }
 0x34a   : > { %p1654_p2 = pneg %p1653_p1 }
 0x34c   : > { %p1661_p6 = pnand %p1660_p5, %p1654_p2 }
 0x34e   : > { %1664 = shalt.err (!%p1661_p6)
}
 0x34f   : > { %s1708_s14 = smov 128   ;;  %s1709_s18 = smov 8  }
 0x350   : > { %1576 = dma.vmem_to_hbm [thread:$0]  (%p2233_p13), %s1219_s13, 2048, %s2261_s4, [#allocation5], %s1708_s14, %s1708_s14, %s1709_s18  }
 0x351   : > { %1688 = dma.done.wait (%p2233_p13), [#allocation5], 2048  }
 0x352   : > { %1690 = vsyncadd (%p2233_p13), [#allocation5], 4294965248 }
 0x353 PF: > { %s15_s17 = sadd.s32 1, %s1701_s17   ;;  %s2263_s15 = smov %s1697_s16 }
 0x354   : > { %p12_p7 = scmp.ge.s32.totalorder %s15_s17, 5   ;;  %s2264_s16 = smov %s2266_s19 }
 0x356   :  { %14 = sbr.rel (!%p12_p7) target bundleno = 2 (0x2), region = 97 }
 0x35b   :  { %1234 = vsyncpa [#allocation5], 1 }
 0x35c   :  { %1236 = vsyncpa [#allocation5 + $0x1], 1 }

</bundles_post_ra>
